<compile_context>
chip_gen: v6e
topology: v6e:2x2x1
jax: 0.10.0
libtpu: 0.0.40
codegen_flags: <defaults>
</compile_context>

<pallas_src>
import jax
import jax.numpy as jnp
import numpy as np
from jax.experimental import pallas as pl
from jax.experimental.pallas import tpu as pltpu

# Branch definitions: (name, in_dim, hid_dim). hid_dim is also the output dim.
BRANCHES = [
    ("position", 4, 8),
    ("dist_to_target", 1, 2),
    ("touch", 2, 4),
    ("target_position", 2, 4),
    ("velocity", 3, 6),
]
D_IN = sum(b[1] for b in BRANCHES)    # 12
D_OUT = sum(b[2] for b in BRANCHES)   # 24
LN_EPS = 1e-5


def _round_up(x: int, m: int) -> int:
    return ((x + m - 1) // m) * m


# ----------------------------------------------------------------------------
# Pallas kernel: fused (block-diag Linear -> ReLU -> block-diag Linear ->
# per-segment LayerNorm) over one batch tile, x_cat never materialized.
# ----------------------------------------------------------------------------
def _finger_kernel(pos_ref, dist_ref, touch_ref, tgt_ref, vel_ref,
                   w1p_ref, w1d_ref, w1t_ref, w1g_ref, w1v_ref,
                   b1_ref, w2_ref, b2_ref, gamma_ref, beta_ref, avg_ref,
                   o_ref):
    f32 = jnp.float32

    # First Linear (block-diagonal W1): 5 tiny matmuls, summed. Each W1 slice is
    # [din_i, 24] with zeros outside its own output segment, so the sum equals
    # x_cat @ W1 exactly. The width-1 dist branch is a broadcast multiply.
    h = jnp.dot(pos_ref[...].astype(f32), w1p_ref[...],
                preferred_element_type=f32)
    h = h + dist_ref[...].astype(f32) * w1d_ref[...]
    h = h + jnp.dot(touch_ref[...].astype(f32), w1t_ref[...],
                    preferred_element_type=f32)
    h = h + jnp.dot(tgt_ref[...].astype(f32), w1g_ref[...],
                    preferred_element_type=f32)
    h = h + jnp.dot(vel_ref[...].astype(f32), w1v_ref[...],
                    preferred_element_type=f32)
    h = jnp.maximum(h + b1_ref[...], 0.0)

    # Second Linear (block-diagonal W2).
    y = jnp.dot(h, w2_ref[...], preferred_element_type=f32) + b2_ref[...]

    # Per-segment LayerNorm (biased variance, like torch.nn.LayerNorm) via the
    # precomputed symmetric segment-averaging matrix A [24, 24]:
    #   (y @ A)[b, j] = mean of y over the segment containing column j.
    mean_b = jnp.dot(y, avg_ref[...], preferred_element_type=f32)
    d = y - mean_b
    var_b = jnp.dot(d * d, avg_ref[...], preferred_element_type=f32)
    y_norm = d * jax.lax.rsqrt(var_b + LN_EPS)

    o_ref[...] = (y_norm * gamma_ref[...] + beta_ref[...]).astype(o_ref.dtype)


def finger_turn_hard_forward(x: dict, params: dict, *, bm: int = 1024,
                             out_dtype=jnp.float32) -> jnp.ndarray:
    """Fused forward pass. `x` is a dict of [B, d_in] (dist_to_target may be [B])."""
    dist = x["dist_to_target"]
    if dist.ndim == 1:
        dist = dist[:, None]
    pos = x["position"]
    touch = x["touch"]
    tgt = x["target_position"]
    vel = x["velocity"]
    B = pos.shape[0]

    # Pick an effective batch tile:
    #  * multiple of 8 (sublane constraint),
    #  * large enough to amortize per-step overhead,
    #  * >= 2 grid steps when the batch allows (megacore sharding on v7x).
    bm_req = max(8, _round_up(int(bm), 8))
    b_pad8 = _round_up(B, 8)
    if b_pad8 >= 16:
        bm_eff = min(bm_req, _round_up(-(-b_pad8 // 2), 8))
    else:
        bm_eff = b_pad8
    Bp = _round_up(B, bm_eff)

    def _prep(a):
        a = a.astype(jnp.float32)
        if Bp != B:
            a = jnp.pad(a, ((0, Bp - B), (0, 0)))
        return a

    pos, dist, touch, tgt, vel = map(_prep, (pos, dist, touch, tgt, vel))

    grid = (Bp // bm_eff,)
    row = lambda i: (i, 0)    # batch-tiled arrays
    full = lambda i: (0, 0)   # parameters: broadcast across the grid

    in_specs = [
        pl.BlockSpec((bm_eff, 4), row),        # position
        pl.BlockSpec((bm_eff, 1), row),        # dist_to_target
        pl.BlockSpec((bm_eff, 2), row),        # touch
        pl.BlockSpec((bm_eff, 2), row),        # target_position
        pl.BlockSpec((bm_eff, 3), row),        # velocity
        pl.BlockSpec((4, D_OUT), full),        # W1 slice: position
        pl.BlockSpec((1, D_OUT), full),        # W1 slice: dist_to_target
        pl.BlockSpec((2, D_OUT), full),        # W1 slice: touch
        pl.BlockSpec((2, D_OUT), full),        # W1 slice: target_position
        pl.BlockSpec((3, D_OUT), full),        # W1 slice: velocity
        pl.BlockSpec((1, D_OUT), full),        # b1
        pl.BlockSpec((D_OUT, D_OUT), full),    # W2 (block-diagonal)
        pl.BlockSpec((1, D_OUT), full),        # b2
        pl.BlockSpec((1, D_OUT), full),        # gamma
        pl.BlockSpec((1, D_OUT), full),        # beta
        pl.BlockSpec((D_OUT, D_OUT), full),    # segment-averaging matrix A
    ]

    out = pl.pallas_call(
        _finger_kernel,
        out_shape=jax.ShapeDtypeStruct((Bp, D_OUT), out_dtype),
        grid_spec=pltpu.PrefetchScalarGridSpec(
            num_scalar_prefetch=0,
            grid=grid,
            in_specs=in_specs,
            out_specs=pl.BlockSpec((bm_eff, D_OUT), row),
        ),
        compiler_params=pltpu.CompilerParams(
            dimension_semantics=("parallel",)),
    )(pos, dist, touch, tgt, vel,
      params["w1_position"], params["w1_dist"], params["w1_touch"],
      params["w1_target"], params["w1_velocity"],
      params["b1"], params["w2"], params["b2"],
      params["gamma"], params["beta"], params["avg"])

    return out[:B] if Bp != B else out


# ----------------------------------------------------------------------------
# Deterministic parameter construction (synthetic init, not a checkpoint).
# ----------------------------------------------------------------------------
def init_params(key) -> dict:
    nseg = len(BRANCHES)
    w1_slices = {}
    w2 = np.zeros((D_OUT, D_OUT), np.float32)
    b1 = np.zeros((1, D_OUT), np.float32)
    b2 = np.zeros((1, D_OUT), np.float32)
    gamma = np.zeros((1, D_OUT), np.float32)
    beta = np.zeros((1, D_OUT), np.float32)
    avg = np.zeros((D_OUT, D_OUT), np.float32)   # A = seg @ diag(1/cnt) @ seg.T

    out_off = 0
    keys = jax.random.split(key, 4 * nseg)
    for si, (name, din, dh) in enumerate(BRANCHES):
        k_w1, k_b1, k_w2, k_b2 = keys[4 * si: 4 * si + 4]
        # PyTorch Linear stores weight as [out, in]; we use its transpose [in, out].
        bw1 = np.asarray(jax.random.normal(k_w1, (din, dh), jnp.float32)) / np.sqrt(din)
        bb1 = np.asarray(jax.random.normal(k_b1, (dh,), jnp.float32)) * 0.1
        bw2 = np.asarray(jax.random.normal(k_w2, (dh, dh), jnp.float32)) / np.sqrt(dh)
        bb2 = np.asarray(jax.random.normal(k_b2, (dh,), jnp.float32)) * 0.1

        w1s = np.zeros((din, D_OUT), np.float32)
        w1s[:, out_off:out_off + dh] = bw1
        w1_slices[name] = w1s
        b1[0, out_off:out_off + dh] = bb1
        w2[out_off:out_off + dh, out_off:out_off + dh] = bw2
        b2[0, out_off:out_off + dh] = bb2
        gamma[0, out_off:out_off + dh] = 1.0   # LayerNorm default weight
        beta[0, out_off:out_off + dh] = 0.0    # LayerNorm default bias
        avg[out_off:out_off + dh, out_off:out_off + dh] = 1.0 / dh
        out_off += dh

    params = dict(
        w1_position=w1_slices["position"],
        w1_dist=w1_slices["dist_to_target"],
        w1_touch=w1_slices["touch"],
        w1_target=w1_slices["target_position"],
        w1_velocity=w1_slices["velocity"],
        b1=b1, w2=w2, b2=b2, gamma=gamma, beta=beta, avg=avg,
    )
    return {k: jnp.asarray(v) for k, v in params.items()}


# ----------------------------------------------------------------------------
# Pure-JAX reference (mirrors the PyTorch forward) for a sanity check.
# ----------------------------------------------------------------------------
def reference_forward(x: dict, params: dict) -> jnp.ndarray:
    dist = x["dist_to_target"]
    if dist.ndim == 1:
        dist = dist[:, None]
    x_cat = jnp.concatenate(
        [x["position"], dist, x["touch"], x["target_position"], x["velocity"]],
        axis=-1).astype(jnp.float32)
    w1 = jnp.concatenate(
        [params["w1_position"], params["w1_dist"], params["w1_touch"],
         params["w1_target"], params["w1_velocity"]], axis=0)
    h = jnp.maximum(x_cat @ w1 + params["b1"], 0.0)
    y = h @ params["w2"] + params["b2"]
    outs = []
    off = 0
    for _, _, dh in BRANCHES:
        seg_y = y[:, off:off + dh]
        mu = jnp.mean(seg_y, axis=-1, keepdims=True)
        var = jnp.mean((seg_y - mu) ** 2, axis=-1, keepdims=True)
        outs.append((seg_y - mu) / jnp.sqrt(var + LN_EPS))
        off += dh
    y_norm = jnp.concatenate(outs, axis=-1)
    return y_norm * params["gamma"] + params["beta"]


def _make_inputs(key, B):
    k_pos, k_dist, k_touch, k_tgt, k_vel = jax.random.split(key, 5)
    return {
        "position": jax.random.normal(k_pos, (B, 4), jnp.float32),
        "dist_to_target": jax.random.normal(k_dist, (B,), jnp.float32),  # 1-D path
        "touch": jax.random.normal(k_touch, (B, 2), jnp.float32),
        "target_position": jax.random.normal(k_tgt, (B, 2), jnp.float32),
        "velocity": jax.random.normal(k_vel, (B, 3), jnp.float32),
    }


if __name__ == "__main__":
    key = jax.random.PRNGKey(0)
    k_param, k_x1, k_x2 = jax.random.split(key, 3)

    params = init_params(k_param)

    # Small batch (single grid step).
    B = 8
    x = _make_inputs(k_x1, B)
    out = jax.block_until_ready(finger_turn_hard_forward(x, params))
    assert out.shape == (B, D_OUT), out.shape
    ref = jax.block_until_ready(reference_forward(x, params))
    np.testing.assert_allclose(np.asarray(out), np.asarray(ref),
                               rtol=1e-5, atol=1e-5)

    # Batch that is not a multiple of the tile (exercises padding + 2-step grid).
    B2 = 37
    x2 = _make_inputs(k_x2, B2)
    out2 = jax.block_until_ready(finger_turn_hard_forward(x2, params))
    assert out2.shape == (B2, D_OUT), out2.shape
    ref2 = jax.block_until_ready(reference_forward(x2, params))
    np.testing.assert_allclose(np.asarray(out2), np.asarray(ref2),
                               rtol=1e-5, atol=1e-5)

    print("KERNEL_OK")
</pallas_src>

<mosaic_0001>
module attributes {stable_mosaic.version = 11 : i64} {
  func.func @_finger_kernel(%arg0: i32, %arg1: memref<8x4xf32, #tpu.memory_space<vmem>>, %arg2: memref<8x1xf32, #tpu.memory_space<vmem>>, %arg3: memref<8x2xf32, #tpu.memory_space<vmem>>, %arg4: memref<8x2xf32, #tpu.memory_space<vmem>>, %arg5: memref<8x3xf32, #tpu.memory_space<vmem>>, %arg6: memref<4x24xf32, #tpu.memory_space<vmem>>, %arg7: memref<1x24xf32, #tpu.memory_space<vmem>>, %arg8: memref<2x24xf32, #tpu.memory_space<vmem>>, %arg9: memref<2x24xf32, #tpu.memory_space<vmem>>, %arg10: memref<3x24xf32, #tpu.memory_space<vmem>>, %arg11: memref<1x24xf32, #tpu.memory_space<vmem>>, %arg12: memref<24x24xf32, #tpu.memory_space<vmem>>, %arg13: memref<1x24xf32, #tpu.memory_space<vmem>>, %arg14: memref<1x24xf32, #tpu.memory_space<vmem>>, %arg15: memref<1x24xf32, #tpu.memory_space<vmem>>, %arg16: memref<24x24xf32, #tpu.memory_space<vmem>>, %arg17: memref<8x24xf32, #tpu.memory_space<vmem>>) attributes {dimension_semantics = [#tpu.dimension_semantics<parallel>], iteration_bounds = array<i64: 1>, scalar_prefetch = 0 : i64, scratch_operands = 0 : i64, tpu.core_type = #tpu.core_type<tc>, window_params = [{transform_indices = @transform_0, window_bounds = array<i64: 8, 4>}, {transform_indices = @transform_1, window_bounds = array<i64: 8, 1>}, {transform_indices = @transform_2, window_bounds = array<i64: 8, 2>}, {transform_indices = @transform_3, window_bounds = array<i64: 8, 2>}, {transform_indices = @transform_4, window_bounds = array<i64: 8, 3>}, {pipeline_mode = #tpu.pipeline_mode<synchronous>, transform_indices = @transform_5, window_bounds = array<i64: 4, 24>}, {pipeline_mode = #tpu.pipeline_mode<synchronous>, transform_indices = @transform_6, window_bounds = array<i64: 1, 24>}, {pipeline_mode = #tpu.pipeline_mode<synchronous>, transform_indices = @transform_7, window_bounds = array<i64: 2, 24>}, {pipeline_mode = #tpu.pipeline_mode<synchronous>, transform_indices = @transform_8, window_bounds = array<i64: 2, 24>}, {pipeline_mode = #tpu.pipeline_mode<synchronous>, transform_indices = @transform_9, window_bounds = array<i64: 3, 24>}, {pipeline_mode = #tpu.pipeline_mode<synchronous>, transform_indices = @transform_10, window_bounds = array<i64: 1, 24>}, {pipeline_mode = #tpu.pipeline_mode<synchronous>, transform_indices = @transform_11, window_bounds = array<i64: 24, 24>}, {pipeline_mode = #tpu.pipeline_mode<synchronous>, transform_indices = @transform_12, window_bounds = array<i64: 1, 24>}, {pipeline_mode = #tpu.pipeline_mode<synchronous>, transform_indices = @transform_13, window_bounds = array<i64: 1, 24>}, {pipeline_mode = #tpu.pipeline_mode<synchronous>, transform_indices = @transform_14, window_bounds = array<i64: 1, 24>}, {pipeline_mode = #tpu.pipeline_mode<synchronous>, transform_indices = @transform_15, window_bounds = array<i64: 24, 24>}, {transform_indices = @transform_16, window_bounds = array<i64: 8, 24>}]} {
    %c0 = arith.constant 0 : index
    %c0_0 = arith.constant 0 : index
    %0 = vector.load %arg1[%c0, %c0_0] : memref<8x4xf32, #tpu.memory_space<vmem>>, vector<8x4xf32>
    %c0_1 = arith.constant 0 : index
    %c0_2 = arith.constant 0 : index
    %1 = vector.load %arg6[%c0_1, %c0_2] : memref<4x24xf32, #tpu.memory_space<vmem>>, vector<4x24xf32>
    %cst = arith.constant dense<0.000000e+00> : vector<8x24xf32>
    %2 = tpu.matmul %0, %1, %cst {dimension_numbers = #tpu.dot_dimension_numbers<[1], [0], [0], [1], [0, 0, 1, 1], [], []>} : vector<8x4xf32>, vector<4x24xf32>, vector<8x24xf32> -> vector<8x24xf32>
    %c0_3 = arith.constant 0 : index
    %c0_4 = arith.constant 0 : index
    %3 = vector.load %arg2[%c0_3, %c0_4] : memref<8x1xf32, #tpu.memory_space<vmem>>, vector<8x1xf32>
    %c0_5 = arith.constant 0 : index
    %c0_6 = arith.constant 0 : index
    %4 = vector.load %arg7[%c0_5, %c0_6] : memref<1x24xf32, #tpu.memory_space<vmem>>, vector<1x24xf32>
    %5 = vector.broadcast %3 : vector<8x1xf32> to vector<8x24xf32>
    %6 = vector.broadcast %4 : vector<1x24xf32> to vector<8x24xf32>
    %7 = arith.mulf %5, %6 : vector<8x24xf32>
    %8 = arith.addf %2, %7 : vector<8x24xf32>
    %c0_7 = arith.constant 0 : index
    %c0_8 = arith.constant 0 : index
    %9 = vector.load %arg3[%c0_7, %c0_8] : memref<8x2xf32, #tpu.memory_space<vmem>>, vector<8x2xf32>
    %c0_9 = arith.constant 0 : index
    %c0_10 = arith.constant 0 : index
    %10 = vector.load %arg8[%c0_9, %c0_10] : memref<2x24xf32, #tpu.memory_space<vmem>>, vector<2x24xf32>
    %cst_11 = arith.constant dense<0.000000e+00> : vector<8x24xf32>
    %11 = tpu.matmul %9, %10, %cst_11 {dimension_numbers = #tpu.dot_dimension_numbers<[1], [0], [0], [1], [0, 0, 1, 1], [], []>} : vector<8x2xf32>, vector<2x24xf32>, vector<8x24xf32> -> vector<8x24xf32>
    %12 = arith.addf %8, %11 : vector<8x24xf32>
    %c0_12 = arith.constant 0 : index
    %c0_13 = arith.constant 0 : index
    %13 = vector.load %arg4[%c0_12, %c0_13] : memref<8x2xf32, #tpu.memory_space<vmem>>, vector<8x2xf32>
    %c0_14 = arith.constant 0 : index
    %c0_15 = arith.constant 0 : index
    %14 = vector.load %arg9[%c0_14, %c0_15] : memref<2x24xf32, #tpu.memory_space<vmem>>, vector<2x24xf32>
    %cst_16 = arith.constant dense<0.000000e+00> : vector<8x24xf32>
    %15 = tpu.matmul %13, %14, %cst_16 {dimension_numbers = #tpu.dot_dimension_numbers<[1], [0], [0], [1], [0, 0, 1, 1], [], []>} : vector<8x2xf32>, vector<2x24xf32>, vector<8x24xf32> -> vector<8x24xf32>
    %16 = arith.addf %12, %15 : vector<8x24xf32>
    %c0_17 = arith.constant 0 : index
    %c0_18 = arith.constant 0 : index
    %17 = vector.load %arg5[%c0_17, %c0_18] : memref<8x3xf32, #tpu.memory_space<vmem>>, vector<8x3xf32>
    %c0_19 = arith.constant 0 : index
    %c0_20 = arith.constant 0 : index
    %18 = vector.load %arg10[%c0_19, %c0_20] : memref<3x24xf32, #tpu.memory_space<vmem>>, vector<3x24xf32>
    %cst_21 = arith.constant dense<0.000000e+00> : vector<8x24xf32>
    %19 = tpu.matmul %17, %18, %cst_21 {dimension_numbers = #tpu.dot_dimension_numbers<[1], [0], [0], [1], [0, 0, 1, 1], [], []>} : vector<8x3xf32>, vector<3x24xf32>, vector<8x24xf32> -> vector<8x24xf32>
    %20 = arith.addf %16, %19 : vector<8x24xf32>
    %c0_22 = arith.constant 0 : index
    %c0_23 = arith.constant 0 : index
    %21 = vector.load %arg11[%c0_22, %c0_23] : memref<1x24xf32, #tpu.memory_space<vmem>>, vector<1x24xf32>
    %22 = vector.broadcast %21 : vector<1x24xf32> to vector<8x24xf32>
    %23 = arith.addf %20, %22 : vector<8x24xf32>
    %cst_24 = arith.constant 0.000000e+00 : f32
    %24 = vector.broadcast %cst_24 : f32 to vector<8x24xf32>
    %25 = arith.maximumf %23, %24 : vector<8x24xf32>
    %c0_25 = arith.constant 0 : index
    %c0_26 = arith.constant 0 : index
    %26 = vector.load %arg12[%c0_25, %c0_26] : memref<24x24xf32, #tpu.memory_space<vmem>>, vector<24x24xf32>
    %cst_27 = arith.constant dense<0.000000e+00> : vector<8x24xf32>
    %27 = tpu.matmul %25, %26, %cst_27 {dimension_numbers = #tpu.dot_dimension_numbers<[1], [0], [0], [1], [0, 0, 1, 1], [], []>} : vector<8x24xf32>, vector<24x24xf32>, vector<8x24xf32> -> vector<8x24xf32>
    %c0_28 = arith.constant 0 : index
    %c0_29 = arith.constant 0 : index
    %28 = vector.load %arg13[%c0_28, %c0_29] : memref<1x24xf32, #tpu.memory_space<vmem>>, vector<1x24xf32>
    %29 = vector.broadcast %28 : vector<1x24xf32> to vector<8x24xf32>
    %30 = arith.addf %27, %29 : vector<8x24xf32>
    %c0_30 = arith.constant 0 : index
    %c0_31 = arith.constant 0 : index
    %31 = vector.load %arg16[%c0_30, %c0_31] : memref<24x24xf32, #tpu.memory_space<vmem>>, vector<24x24xf32>
    %cst_32 = arith.constant dense<0.000000e+00> : vector<8x24xf32>
    %32 = tpu.matmul %30, %31, %cst_32 {dimension_numbers = #tpu.dot_dimension_numbers<[1], [0], [0], [1], [0, 0, 1, 1], [], []>} : vector<8x24xf32>, vector<24x24xf32>, vector<8x24xf32> -> vector<8x24xf32>
    %33 = arith.subf %30, %32 : vector<8x24xf32>
    %34 = arith.mulf %33, %33 : vector<8x24xf32>
    %c0_33 = arith.constant 0 : index
    %c0_34 = arith.constant 0 : index
    %35 = vector.load %arg16[%c0_33, %c0_34] : memref<24x24xf32, #tpu.memory_space<vmem>>, vector<24x24xf32>
    %cst_35 = arith.constant dense<0.000000e+00> : vector<8x24xf32>
    %36 = tpu.matmul %34, %35, %cst_35 {dimension_numbers = #tpu.dot_dimension_numbers<[1], [0], [0], [1], [0, 0, 1, 1], [], []>} : vector<8x24xf32>, vector<24x24xf32>, vector<8x24xf32> -> vector<8x24xf32>
    %cst_36 = arith.constant 9.99999974E-6 : f32
    %37 = vector.broadcast %cst_36 : f32 to vector<8x24xf32>
    %38 = arith.addf %36, %37 : vector<8x24xf32>
    %39 = math.rsqrt %38 : vector<8x24xf32>
    %40 = arith.mulf %33, %39 : vector<8x24xf32>
    %c0_37 = arith.constant 0 : index
    %c0_38 = arith.constant 0 : index
    %41 = vector.load %arg14[%c0_37, %c0_38] : memref<1x24xf32, #tpu.memory_space<vmem>>, vector<1x24xf32>
    %42 = vector.broadcast %41 : vector<1x24xf32> to vector<8x24xf32>
    %43 = arith.mulf %40, %42 : vector<8x24xf32>
    %c0_39 = arith.constant 0 : index
    %c0_40 = arith.constant 0 : index
    %44 = vector.load %arg15[%c0_39, %c0_40] : memref<1x24xf32, #tpu.memory_space<vmem>>, vector<1x24xf32>
    %45 = vector.broadcast %44 : vector<1x24xf32> to vector<8x24xf32>
    %46 = arith.addf %43, %45 : vector<8x24xf32>
    %c0_41 = arith.constant 0 : index
    %c0_42 = arith.constant 0 : index
    %47 = vector.load %arg17[%c0_41, %c0_42] : memref<8x24xf32, #tpu.memory_space<vmem>>, vector<8x24xf32>
    tpu.vector_store %arg17[%c0_41, %c0_42], %46 {strides = array<i32>} : memref<8x24xf32, #tpu.memory_space<vmem>>, vector<8x24xf32>,
    return
  }
  func.func @transform_0(%arg0: i32) -> (i32, i32) {
    %c0_i32 = arith.constant 0 : i32
    %c0_i32_0 = arith.constant 0 : i32
    return %arg0, %c0_i32 : i32, i32
  }
  func.func @transform_1(%arg0: i32) -> (i32, i32) {
    %c0_i32 = arith.constant 0 : i32
    %c0_i32_0 = arith.constant 0 : i32
    return %arg0, %c0_i32 : i32, i32
  }
  func.func @transform_2(%arg0: i32) -> (i32, i32) {
    %c0_i32 = arith.constant 0 : i32
    %c0_i32_0 = arith.constant 0 : i32
    return %arg0, %c0_i32 : i32, i32
  }
  func.func @transform_3(%arg0: i32) -> (i32, i32) {
    %c0_i32 = arith.constant 0 : i32
    %c0_i32_0 = arith.constant 0 : i32
    return %arg0, %c0_i32 : i32, i32
  }
  func.func @transform_4(%arg0: i32) -> (i32, i32) {
    %c0_i32 = arith.constant 0 : i32
    %c0_i32_0 = arith.constant 0 : i32
    return %arg0, %c0_i32 : i32, i32
  }
  func.func @transform_5(%arg0: i32) -> (i32, i32) {
    %c0_i32 = arith.constant 0 : i32
    %c0_i32_0 = arith.constant 0 : i32
    %c0_i32_1 = arith.constant 0 : i32
    return %c0_i32, %c0_i32_0 : i32, i32
  }
  func.func @transform_6(%arg0: i32) -> (i32, i32) {
    %c0_i32 = arith.constant 0 : i32
    %c0_i32_0 = arith.constant 0 : i32
    %c0_i32_1 = arith.constant 0 : i32
    return %c0_i32, %c0_i32_0 : i32, i32
  }
  func.func @transform_7(%arg0: i32) -> (i32, i32) {
    %c0_i32 = arith.constant 0 : i32
    %c0_i32_0 = arith.constant 0 : i32
    %c0_i32_1 = arith.constant 0 : i32
    return %c0_i32, %c0_i32_0 : i32, i32
  }
  func.func @transform_8(%arg0: i32) -> (i32, i32) {
    %c0_i32 = arith.constant 0 : i32
    %c0_i32_0 = arith.constant 0 : i32
    %c0_i32_1 = arith.constant 0 : i32
    return %c0_i32, %c0_i32_0 : i32, i32
  }
  func.func @transform_9(%arg0: i32) -> (i32, i32) {
    %c0_i32 = arith.constant 0 : i32
    %c0_i32_0 = arith.constant 0 : i32
    %c0_i32_1 = arith.constant 0 : i32
    return %c0_i32, %c0_i32_0 : i32, i32
  }
  func.func @transform_10(%arg0: i32) -> (i32, i32) {
    %c0_i32 = arith.constant 0 : i32
    %c0_i32_0 = arith.constant 0 : i32
    %c0_i32_1 = arith.constant 0 : i32
    return %c0_i32, %c0_i32_0 : i32, i32
  }
  func.func @transform_11(%arg0: i32) -> (i32, i32) {
    %c0_i32 = arith.constant 0 : i32
    %c0_i32_0 = arith.constant 0 : i32
    %c0_i32_1 = arith.constant 0 : i32
    return %c0_i32, %c0_i32_0 : i32, i32
  }
  func.func @transform_12(%arg0: i32) -> (i32, i32) {
    %c0_i32 = arith.constant 0 : i32
    %c0_i32_0 = arith.constant 0 : i32
    %c0_i32_1 = arith.constant 0 : i32
    return %c0_i32, %c0_i32_0 : i32, i32
  }
  func.func @transform_13(%arg0: i32) -> (i32, i32) {
    %c0_i32 = arith.constant 0 : i32
    %c0_i32_0 = arith.constant 0 : i32
    %c0_i32_1 = arith.constant 0 : i32
    return %c0_i32, %c0_i32_0 : i32, i32
  }
  func.func @transform_14(%arg0: i32) -> (i32, i32) {
    %c0_i32 = arith.constant 0 : i32
    %c0_i32_0 = arith.constant 0 : i32
    %c0_i32_1 = arith.constant 0 : i32
    return %c0_i32, %c0_i32_0 : i32, i32
  }
  func.func @transform_15(%arg0: i32) -> (i32, i32) {
    %c0_i32 = arith.constant 0 : i32
    %c0_i32_0 = arith.constant 0 : i32
    %c0_i32_1 = arith.constant 0 : i32
    return %c0_i32, %c0_i32_0 : i32, i32
  }
  func.func @transform_16(%arg0: i32) -> (i32, i32) {
    %c0_i32 = arith.constant 0 : i32
    %c0_i32_0 = arith.constant 0 : i32
    return %arg0, %c0_i32 : i32, i32
  }
}

</mosaic_0001>

<bundles_post_ra>
// kernel: tpu_custom_call.1
= control target key start
LH: loop header
LB: loop body
LE: loop exit
PB: predicated region body
PF: predicated region fallthrough
CT: control target
= control target key end

     0   :  { %s961_s0 = inlined_call_operand.vmem [shape: f32[8,4], index: 0, kind: input, shape index: {}]   ;;  %s962_s1 = inlined_call_operand.vmem [shape: f32[8,1], index: 1, kind: input, shape index: {}]   ;;  %s963_s2 = inlined_call_operand.vmem [shape: f32[8,2], index: 2, kind: input, shape index: {}]   ;;  %s964_s3 = inlined_call_operand.vmem [shape: f32[8,2], index: 3, kind: input, shape index: {}]   ;;  %s965_s4 = inlined_call_operand.vmem [shape: f32[8,3], index: 4, kind: input, shape index: {}]   ;;  %s966_s5 = inlined_call_operand.vmem [shape: f32[4,24], index: 5, kind: input, shape index: {}]   ;;  %s967_s6 = inlined_call_operand.vmem [shape: f32[1,24], index: 6, kind: input, shape index: {}]   ;;  %s968_s7 = inlined_call_operand.vmem [shape: f32[2,24], index: 7, kind: input, shape index: {}]   ;;  %s969_s8 = inlined_call_operand.vmem [shape: f32[2,24], index: 8, kind: input, shape index: {}]   ;;  %s970_s9 = inlined_call_operand.vmem [shape: f32[3,24], index: 9, kind: input, shape index: {}]   ;;  %s971_s10 = inlined_call_operand.vmem [shape: f32[1,24], index: 10, kind: input, shape index: {}]   ;;  %s972_s11 = inlined_call_operand.vmem [shape: f32[24,24], index: 11, kind: input, shape index: {}]   ;;  %s973_s12 = inlined_call_operand.vmem [shape: f32[1,24], index: 12, kind: input, shape index: {}]   ;;  %s974_s13 = inlined_call_operand.vmem [shape: f32[1,24], index: 13, kind: input, shape index: {}]   ;;  %s975_s14 = inlined_call_operand.vmem [shape: f32[1,24], index: 14, kind: input, shape index: {}]   ;;  %s976_s15 = inlined_call_operand.vmem [shape: f32[24,24], index: 15, kind: input, shape index: {}]   ;;  %s977_s16 = inlined_call_operand.hbm [shape: f32[8,24], index: 16, kind: output, shape index: {}]  }
   0x1   :  { %978 = sst [smem:[#allocation5_spill]] %s961_s0 }
   0x2   :  { %v55_v0 = vld [vmem:[%s966_s5] sm:$0xf]  ;;  %vm74_vm0 = vcmask 1043456   ;;  %s979_s25 = sld [smem:[#allocation5_spill]]  ;;  %v778_v2 = vmov 0.0   ;;  %vm779_vm1 = vmmov 0  }
   0x3   :  { %702 = vmatprep.subr.mxu1 %v778_v2  ;;  %704 = vmatprep.mubr.msk.f32.mxu1 %vm779_vm1, %v778_v2  ;;  %vm70_vm2 = vcmask 31744   ;;  %v149_v3 = vld [vmem:[%s968_s7] sm:$0x3]  ;;  %vm154_vm3 = vcmask 1041408   ;;  %vm150_vm4 = vcmask 15360  }
   0x4   :  { %703 = vmatpush3.msk.msra.mxu1 %vm74_vm0, %v55_v0  ;;  %712 = vmatprep.subr.mxu0 %v778_v2  ;;  %v230_v4 = vld [vmem:[%s969_s8] sm:$0x3] }
   0x5   :  { %707 = vmatprep.subr.mxu1 %v778_v2  ;;  %v229_v5 = vld [vmem:[%s964_s3] sm:$0xff] }
   0x6   :  { %v148_v6 = vld [vmem:[%s963_s2] sm:$0xff] }
   0x8   :  { %v54_v1 = vld [vmem:[%s979_s25] sm:$0xff] }
   0x9   :  { %705 = vmatmul.mubr.msk.f32.vlgmr.msra.gmra.mxu1 %vm70_vm2, %v54_v1 }
   0xa   :  { %708 = vmatpush3.msk.msra.mxu1 %vm154_vm3, %v149_v3  ;;  %709 = vmatprep.mubr.msk.f32.mxu1 %vm779_vm1, %v778_v2 }
   0xb   :  { %21 = vsyncpa [#allocation3], 0  ;;  %713 = vmatpush3.msk.msra.mxu0 %vm154_vm3, %v230_v4  ;;  %714 = vmatprep.mubr.msk.f32.mxu0 %vm779_vm1, %v778_v2  ;;  %v309_v7 = vld [vmem:[%s970_s9] sm:$0x7]  ;;  %vm314_vm5 = vcmask 1042432   ;;  %v780_v9 = vmov 0  }
   0xc   :  { %717 = vmatprep.subr.mxu1 %v778_v2  ;;  %715 = vmatmul.mubr.msk.f32.vlgmr.msra.gmra.mxu0 %vm150_vm4, %v229_v5  ;;  %v56_v8 = vld [vmem:[%s962_s1] sm:$0xff]  ;;  %vm310_vm6 = vcmask 23552   ;;  %v400_v11 = vld [vmem:[%s972_s11 + $0x10] sm:$0xff]  ;;  %v399_v12 = vld [vmem:[%s972_s11 + $0x8] sm:$0xff]  ;;  %vm408_vm7 = vcmask 195584   ;;  %s781_s8 = smov [#allocation2]  }
   0xd   :  { %710 = vmatmul.mubr.msk.f32.vlgmr.msra.gmra.mxu1 %vm150_vm4, %v148_v6  ;;  %753 = vset.pattern.permute.xlu0 %v780_v9  ;;  %v308_v10 = vld [vmem:[%s965_s4] sm:$0xff]  ;;  %v484_v14 = vld [vmem:[%s976_s15 + $0x10] sm:$0xff]  ;;  %v483_v33 = vld [vmem:[%s976_s15 + $0x8] sm:$0xff]  ;;  %s658_s17 = sshll.u32 %s781_s8, 4  ;;  %s659_s17 = int_to_ptr.vmem [resolvable:$true] %s658_s17 }
   0xe   :  { %718 = vmatpush3.msk.msra.mxu1 %vm314_vm5, %v309_v7  ;;  %719 = vmatprep.mubr.msk.f32.mxu1 %vm779_vm1, %v778_v2  ;;  %v398_v13 = vld [vmem:[%s972_s11] sm:$0xff]  ;;  %s756_s3 = scalar_lea.vmem %s659_s17, 128  ;;  %p761_p1 = scmp.lt.s32.totalorder %s659_s17, %s659_s17 }
   0xf   :  { %60 = vperm.xlu0 %753, %v56_v8   ;;  %722 = vmatprep.subr.mxu0 %v778_v2  ;;  %v666_v15 = vld [vmem:[%s967_s6] ss:$0 sm:$0xff]  ;;  %p757_p0 = scmp.ne.s32.totalorder %s659_s17, %s756_s3  ;;  %p762_p2 = scmp.lt.s32.totalorder %s756_s3, %s756_s3 }
  0x10   :  { %728 = vmatprep.mubr.msk.f32.mxu0 %vm779_vm1, %v778_v2  ;;  %731 = vmatprep.subr.mxu1 %v778_v2  ;;  %v675_v28 = vld [vmem:[%s971_s10] ss:$0 sm:$0xff] }
  0x11   :  { %720 = vmatmul.mubr.msk.f32.vlgmr.msra.gmra.mxu1 %vm310_vm6, %v308_v10  ;;  %723 = vmatpush3.msra.mxu0 %v400_v11  ;;  %v482_v34 = vld [vmem:[%s976_s15] sm:$0xff]  ;;  %p763_p3 = por %p762_p2, %p761_p1 }
  0x12   :  { %737 = vmatprep.mubr.msk.f32.mxu1 %vm779_vm1, %v778_v2  ;;  %724 = vmatprep.subr.mxu0 %v778_v2  ;;  %v676_v35 = vld [vmem:[%s973_s12] ss:$0 sm:$0xff] }
  0x13   :  { %725 = vmatpush3.msra.mxu0 %v399_v12  ;;  %732 = vmatpush3.msra.mxu1 %v484_v14  ;;  %v680_v47 = vld [vmem:[%s974_s13] ss:$0 sm:$0xff]  ;;  %p764_p4 = pnand %p763_p3, %p757_p0 }
  0x14   :  { %726 = vmatprep.subr.mxu0 %v778_v2  ;;  %733 = vmatprep.subr.mxu1 %v778_v2  ;;  %v681_v49 = vld [vmem:[%s975_s14] ss:$0 sm:$0xff] }
  0x15   :  { %727 = vmatpush3.msra.mxu0 %v398_v13  ;;  %734 = vmatpush3.msra.mxu1 %v483_v33 }
  0x16   :  { %740 = vmatprep.subr.mxu0 %v778_v2  ;;  %735 = vmatprep.subr.mxu1 %v778_v2 }
  0x17   :  { %736 = vmatpush3.msra.mxu1 %v482_v34 }
  0x8a   :  { %v61_v16 = vpop.permute.xlu0 %60 }
  0x8b   :  { %v69_v17 = vmul.f32 %v666_v15, %v61_v16 }
  0xc9   :  { %v144_v18 = vpop.f32.mrf.mxu1 }
  0xca   :  { %v145_v20 = vadd.f32 %v144_v18, %v69_v17 }
  0xcb   :  { %v706_v19 = vpop.f32.mrf.mxu1 }
  0xcc   :  { %v303_v21 = vpop.f32.mrf.mxu0 }
  0xcd   :  { %v224_v22 = vpop.f32.mrf.mxu1 }
  0xce   :  { %v228_v23 = vadd.f32 %v224_v22, %v145_v20  ;;  %v716_v24 = vpop.f32.mrf.mxu0 }
  0xcf   :  { %v711_v25 = vpop.f32.mrf.mxu1 }
  0xd0   :  { %v307_v26 = vadd.f32 %v303_v21, %v228_v23 }
  0xd1   :  { %v384_v27 = vpop.f32.mrf.mxu1 }
  0xd2   :  { %v388_v29 = vadd.f32 %v384_v27, %v307_v26 }
  0xd3   :  { %v721_v30 = vpop.f32.mrf.mxu1 }
  0xd4   :  { %v396_v31 = vadd.f32 %v675_v28, %v388_v29 }
  0xd6   :  { %v397_v32 = vmax.f32 %v396_v31, 0.0 }
  0xd8   :  { %729 = vmatmul.mubr.msk.f32.vlgmr.msra.gmra.mxu0 %vm408_vm7, %v397_v32 }
  0xd9   :  { %741 = vmatpush3.msra.mxu0 %v484_v14  ;;  %746 = vmatprep.mubr.msk.f32.mxu0 %vm779_vm1, %v778_v2 }
  0xda   :  { %742 = vmatprep.subr.mxu0 %v778_v2 }
  0xdb   :  { %743 = vmatpush3.msra.mxu0 %v483_v33 }
  0xdc   :  { %744 = vmatprep.subr.mxu0 %v778_v2 }
  0xdd   :  { %745 = vmatpush3.msra.mxu0 %v482_v34 }
 0x198   :  { %v478_v36 = vpop.f32.mrf.mxu0 }
 0x199   :  { %v479_v37 = vadd.f32 %v676_v35, %v478_v36 }
 0x19a   :  { %v730_v38 = vpop.f32.mrf.mxu0 }
 0x19b   :  { %738 = vmatmul.mubr.msk.f32.vlgmr.msra.gmra.mxu1 %vm408_vm7, %v479_v37 }
 0x25b   :  { %v554_v39 = vpop.f32.mrf.mxu1 }
 0x25c   :  { %v558_v40 = vsub.f32 %v479_v37, %v554_v39 }
 0x25d   :  { %v739_v41 = vpop.f32.mrf.mxu1 }
 0x25e   :  { %v559_v42 = vmul.f32 %v558_v40, %v558_v40 }
 0x260   :  { %747 = vmatmul.mubr.msk.f32.vlgmr.msra.gmra.mxu0 %vm408_vm7, %v559_v42 }
 0x320   :  { %v629_v43 = vpop.f32.mrf.mxu0 }
 0x321   :  { %v630_v44 = vadd.f32 1e-05, %v629_v43 }
 0x322   :  { %v748_v45 = vpop.f32.mrf.mxu0 }
 0x323   :  { %754 = vrsqrt.f32 %v630_v44 }
 0x330   :  { %v755_v46 = vpop.eup %754 }
 0x331   :  { %v634_v48 = vmul.f32 %v755_v46, %v558_v40 }
 0x333   :  { %v642_v50 = vmul.f32 %v680_v47, %v634_v48 }
 0x335   :  { %v650_v51 = vadd.f32 %v681_v49, %v642_v50 }
 0x337   :  { %651 = vst.msk [vmem:[#allocation2] sm:$0xff] %vm408_vm7, %v650_v51 }
 0x338   :  { %767 = shalt.err (!%p764_p4)
}
 0x339   :  { %661 = dma.vmem_to_hbm [thread:$0]  %s659_s17, 128, %s977_s16, [#allocation3]  }
 0x33a   :  { %776 = dma.done.wait [#allocation3], 128  }
 0x33b   :  { %777 = vsyncadd [#allocation3], 4294967168 }
 0x33c   :  { %665 = vsyncpa [#allocation3], 1 }

</bundles_post_ra>
